<compile_context>
chip_gen: v5e
topology: v5e:2x2
jax: 0.10.0
libtpu: 0.0.40
codegen_flags: <defaults>
</compile_context>

<pallas_src>
import functools
import numpy as np
import jax
import jax.numpy as jnp
from jax import lax
from jax.experimental import pallas as pl
from jax.experimental.pallas import tpu as pltpu

LANE = 128


def _round_up(x, m):
    return ((x + m - 1) // m) * m


@functools.lru_cache(maxsize=1)
def _tc_per_chip():
    """2 TensorCores per chip on v7x (and megacore chips); 1 on v5e/v6e."""
    try:
        kind = jax.devices()[0].device_kind.lower()
    except Exception:
        return 1
    if "v7" in kind or "7x" in kind or "v4" in kind or "v5p" in kind:
        return 2
    return 1


def _row_tile(m):
    """16-sublane-aligned row tile (bf16 friendly). Large tiles for big N;
    for small N split into >=2 grid steps only when the chip has 2 TCs."""
    if m >= 1024:
        return 512
    if m >= 512:
        return 256
    steps = _tc_per_chip()
    return max(16, _round_up(-(-m // steps), 16))


# ----------------------------------------------------------------------------
# Fused HGNN_conv:  G @ relu(x @ W + b), contraction-tiled over N.
# ----------------------------------------------------------------------------
def _hgnn_conv_kernel(g_ref, x_ref, w_ref, b_ref, o_ref, acc_ref):
    k = pl.program_id(1)

    @pl.when(k == 0)
    def _():
        acc_ref[...] = jnp.zeros_like(acc_ref)

    # hidden activation only for this (tk, K) slice of x -> bounded VMEM
    h = jnp.dot(x_ref[...], w_ref[...], preferred_element_type=jnp.float32)
    h = jnp.maximum(h + b_ref[...], 0.0)
    acc_ref[...] += jnp.dot(g_ref[...], h.astype(jnp.bfloat16),
                            preferred_element_type=jnp.float32)

    @pl.when(k == pl.num_programs(1) - 1)
    def _():
        o_ref[...] = acc_ref[...].astype(o_ref.dtype)


def pallas_hgnn_conv(G, x, w, b):
    """y = G @ relu(x @ w + b); returns lane-dense (N, round_up(d_h,128)) f32."""
    N = G.shape[0]
    K = x.shape[1]
    d_h = w.shape[1]
    d_pad = _round_up(d_h, LANE)
    wb = jnp.pad(w.astype(jnp.float32),
                 ((0, 0), (0, d_pad - d_h))).astype(jnp.bfloat16)
    bb = jnp.pad(b.astype(jnp.float32), (0, d_pad - d_h)).reshape(1, d_pad)

    tm = _row_tile(N)
    m_pad = _round_up(N, tm)
    # contraction (columns of G / rows of x) tile
    if N >= 1024:
        tk = 512
    elif N >= 256:
        tk = 256
    else:
        tk = _round_up(N, 16)          # == full padded contraction dim
    k_pad = _round_up(N, tk)

    # padded G columns / x rows contribute 0 to G@h (zero G weight), so relu(b)
    # on padded x rows never reaches the output
    Gp = jnp.pad(G.astype(jnp.float32),
                 ((0, m_pad - N), (0, k_pad - N))).astype(jnp.bfloat16)
    xp = jnp.pad(x.astype(jnp.float32),
                 ((0, k_pad - N), (0, 0))).astype(jnp.bfloat16)

    n_row_tiles = m_pad // tm
    flops = 2.0 * m_pad * k_pad * d_pad + 2.0 * k_pad * K * d_pad * n_row_tiles
    bytes_acc = (Gp.size * 2 + xp.size * 2 * n_row_tiles + m_pad * d_pad * 4
                 + wb.size * 2 + bb.size * 4)

    out = pl.pallas_call(
        _hgnn_conv_kernel,
        out_shape=jax.ShapeDtypeStruct((m_pad, d_pad), jnp.float32),
        grid=(m_pad // tm, k_pad // tk),
        in_specs=[
            pl.BlockSpec((tm, tk), lambda i, k: (i, k)),
            pl.BlockSpec((tk, K), lambda i, k: (k, 0)),
            pl.BlockSpec((K, d_pad), lambda i, k: (0, 0)),
            pl.BlockSpec((1, d_pad), lambda i, k: (0, 0)),
        ],
        out_specs=pl.BlockSpec((tm, d_pad), lambda i, k: (i, 0)),
        scratch_shapes=[pltpu.VMEM((tm, d_pad), jnp.float32)],
        compiler_params=pltpu.CompilerParams(
            dimension_semantics=("parallel", "arbitrary")),
        cost_estimate=pl.CostEstimate(flops=int(flops), transcendentals=0,
                                      bytes_accessed=int(bytes_acc)),
    )(Gp, xp, wb, bb)
    return out[:N]            # keep zero-padded feature columns (lane-dense)


# ----------------------------------------------------------------------------
# Cosine-similarity matmul: sim = x_n @ x_n.T, contracted in-kernel (no HBM
# transpose), bf16 operands, f32 accumulate.
# ----------------------------------------------------------------------------
def _cosine_sim_kernel(a_ref, b_ref, o_ref):
    o_ref[...] = lax.dot_general(
        a_ref[...], b_ref[...], (((1,), (1,)), ((), ())),
        preferred_element_type=jnp.float32).astype(o_ref.dtype)


def pallas_cosine_sim(x_n):
    # TODO(synk): for very wide embeddings the d contraction would also need
    # tiling; d here is always the 128-padded hidden width.
    N, d = x_n.shape
    xb = x_n.astype(jnp.bfloat16)
    tc = 512 if N > 2048 else _round_up(N, LANE)     # lane-dense output columns
    n_pad = _round_up(N, tc)
    tm = _row_tile(N)
    m_pad = _round_up(N, tm)
    a = jnp.pad(xb, ((0, m_pad - N), (0, 0)))
    b = jnp.pad(xb, ((0, n_pad - N), (0, 0)))

    out = pl.pallas_call(
        _cosine_sim_kernel,
        out_shape=jax.ShapeDtypeStruct((m_pad, n_pad), jnp.float32),
        grid=(m_pad // tm, n_pad // tc),
        in_specs=[pl.BlockSpec((tm, d), lambda i, j: (i, 0)),
                  pl.BlockSpec((tc, d), lambda i, j: (j, 0))],
        out_specs=pl.BlockSpec((tm, tc), lambda i, j: (i, j)),
        compiler_params=pltpu.CompilerParams(
            dimension_semantics=("parallel", "parallel")),
        cost_estimate=pl.CostEstimate(
            flops=int(2.0 * m_pad * n_pad * d), transcendentals=0,
            bytes_accessed=int(a.size * 2 * (n_pad // tc)
                               + b.size * 2 * (m_pad // tm)
                               + m_pad * n_pad * 4)),
    )(a, b)
    return out[:N, :N]


# ----------------------------------------------------------------------------
# VertexConv: grouped Conv1d(k, k*k, d) -> softmax multiplier -> Conv1d(k,1,1)
# as ONE block-diagonal MXU dot + tiny per-group lane softmaxes.
# ----------------------------------------------------------------------------
def _vertex_conv_kernel(reg_ref, wbd_ref, bbd_ref, w1_ref, b1v_ref, o_ref, *, k, d):
    reg = reg_ref[...]                                    # (tn, k*d) f32
    # mult[n, i*k+j] = <wkk[i, j], reg[n, i]> + bkk[i, j]  (block-diag weight)
    mult = jnp.dot(reg.astype(jnp.bfloat16), wbd_ref[...],
                   preferred_element_type=jnp.float32)    # (tn, kk_pad)
    mult = mult + bbd_ref[...]
    # per-group softmax over j, folded with the Conv1d(k,1,1) weight by linearity:
    #   out[n] = sum_j (sum_i w1[i] * p_i[n, j]) * reg[n, j] + b1
    q = None
    for i in range(k):
        mi = mult[:, i * k:(i + 1) * k]                   # (tn, k)
        m = jnp.max(mi, axis=-1, keepdims=True)
        e = jnp.exp(mi - m)
        p = e * pl.reciprocal(jnp.sum(e, axis=-1, keepdims=True), approx=True)
        term = w1_ref[0, i] * p                           # scalar from SMEM
        q = term if q is None else q + term               # (tn, k)
    out = jnp.zeros((reg.shape[0], d), jnp.float32)
    for j in range(k):
        out = out + q[:, j:j + 1] * reg[:, j * d:(j + 1) * d]
    o_ref[...] = (out + b1v_ref[...]).astype(o_ref.dtype)


def pallas_vertex_conv(region, params):
    wkk, bkk, w1, b1 = params
    N, k, d = region.shape
    d_h = wkk.shape[-1]
    kk = k * k
    kk_pad = _round_up(kk, LANE)

    # block-diagonal grouped-conv weight: (k*d, kk_pad), bf16 MXU operand
    wkk_p = jnp.pad(wkk.astype(jnp.float32), ((0, 0), (0, 0), (0, d - d_h)))
    wbd = jnp.zeros((k * d, kk_pad), jnp.float32)
    for i in range(k):
        wbd = wbd.at[i * d:(i + 1) * d, i * k:(i + 1) * k].set(wkk_p[i].T)
    wbd = wbd.astype(jnp.bfloat16)
    bbd = jnp.pad(bkk.astype(jnp.float32).reshape(1, kk),
                  ((0, 0), (0, kk_pad - kk)))
    # lane-masked Conv1d(k,1,1) bias: padded feature lanes stay exactly 0
    b1v = jnp.where(jnp.arange(d) < d_h,
                    b1.astype(jnp.float32).reshape(()), 0.0).reshape(1, d)
    w1s = w1.astype(jnp.float32).reshape(1, k)

    tn = _row_tile(N)
    n_pad = _round_up(N, tn)
    # pre-flattened (N, k*d): no sublane-padded (tn, k, d) block in the kernel
    reg_flat = jnp.pad(region.astype(jnp.float32).reshape(N, k * d),
                       ((0, n_pad - N), (0, 0)))

    out = pl.pallas_call(
        functools.partial(_vertex_conv_kernel, k=k, d=d),
        out_shape=jax.ShapeDtypeStruct((n_pad, d), jnp.float32),
        grid=(n_pad // tn,),
        in_specs=[
            pl.BlockSpec((tn, k * d), lambda i: (i, 0)),
            pl.BlockSpec((k * d, kk_pad), lambda i: (0, 0)),
            pl.BlockSpec((1, kk_pad), lambda i: (0, 0)),
            pl.BlockSpec(memory_space=pltpu.MemorySpace.SMEM),   # w1 (1, k)
            pl.BlockSpec((1, d), lambda i: (0, 0)),              # masked b1 vector
        ],
        out_specs=pl.BlockSpec((tn, d), lambda i: (i, 0)),
        compiler_params=pltpu.CompilerParams(dimension_semantics=("parallel",)),
    )(reg_flat, wbd, bbd, w1s, b1v)
    return out[:N]


# ----------------------------------------------------------------------------
# EdgeConv (MLP scores -> softmax over hyperedges -> weighted sum), fused with
# the DHGLayer fc + sigmoid.  Hyperedge axis is LEADING (sublane-dense block).
# ----------------------------------------------------------------------------
def _edge_conv_kernel(ft_ref, w1_ref, b1_ref, w2t_ref, b2_ref,
                      fcw_ref, fcb_ref, o_ref):
    t = ft_ref.shape[0]
    ft_slabs = [ft_ref[i] for i in range(t)]              # each (tn, d) f32
    scores = []
    for i in range(t):
        hid = jnp.dot(ft_slabs[i].astype(jnp.bfloat16), w1_ref[...],
                      preferred_element_type=jnp.float32)  # (tn, h_pad)
        hid = jnp.maximum(hid + b1_ref[...], 0.0)
        # w2t is zero in padded lanes -> the lane reduce is one masked vreg
        scores.append(jnp.sum(hid * w2t_ref[...], axis=-1, keepdims=True)
                      + b2_ref[0, 0])
    score = jnp.concatenate(scores, axis=-1)               # (tn, t)
    m = jnp.max(score, axis=-1, keepdims=True)
    e = jnp.exp(score - m)
    sm = e * pl.reciprocal(jnp.sum(e, axis=-1, keepdims=True), approx=True)
    agg = jnp.zeros_like(ft_slabs[0])
    for i in range(t):
        agg = agg + sm[:, i:i + 1] * ft_slabs[i]            # (tn, d)
    # fused DHGLayer fc + sigmoid (avoids an 8-lane HBM round-trip)
    y = jnp.dot(agg.astype(jnp.bfloat16), fcw_ref[...],
                preferred_element_type=jnp.float32)
    o_ref[...] = jax.nn.sigmoid(y + fcb_ref[...]).astype(o_ref.dtype)


def pallas_edge_conv_fc(ft, ec_params, fc_w, fc_b, n_out):
    w1, b1, w2t, b2 = ec_params
    t, N, d = ft.shape
    h = w1.shape[1]
    h_pad = _round_up(h, LANE)
    w1p = jnp.pad(w1.astype(jnp.float32),
                  ((0, d - w1.shape[0]), (0, h_pad - h))).astype(jnp.bfloat16)
    b1p = jnp.pad(b1.astype(jnp.float32).reshape(1, -1),
                  ((0, 0), (0, h_pad - h)))
    w2tp = jnp.pad(w2t.astype(jnp.float32), ((0, 0), (0, h_pad - h)))
    nc_pad = _round_up(n_out, LANE)
    fcwp = jnp.pad(fc_w.astype(jnp.float32),
                   ((0, d - fc_w.shape[0]), (0, nc_pad - n_out))
                   ).astype(jnp.bfloat16)
    fcbp = jnp.pad(fc_b.astype(jnp.float32).reshape(1, -1),
                   ((0, 0), (0, nc_pad - n_out)))

    tn = _row_tile(N)
    n_pad = _round_up(N, tn)
    ftp = jnp.pad(ft.astype(jnp.float32), ((0, 0), (0, n_pad - N), (0, 0)))

    out = pl.pallas_call(
        _edge_conv_kernel,
        out_shape=jax.ShapeDtypeStruct((n_pad, nc_pad), jnp.float32),
        grid=(n_pad // tn,),
        in_specs=[
            pl.BlockSpec((t, tn, d), lambda i: (0, i, 0)),
            pl.BlockSpec((d, h_pad), lambda i: (0, 0)),
            pl.BlockSpec((1, h_pad), lambda i: (0, 0)),
            pl.BlockSpec((1, h_pad), lambda i: (0, 0)),
            pl.BlockSpec(memory_space=pltpu.MemorySpace.SMEM),   # b2 scalar
            pl.BlockSpec((d, nc_pad), lambda i: (0, 0)),
            pl.BlockSpec((1, nc_pad), lambda i: (0, 0)),
        ],
        out_specs=pl.BlockSpec((tn, nc_pad), lambda i: (i, 0)),
        compiler_params=pltpu.CompilerParams(dimension_semantics=("parallel",)),
    )(ftp, w1p, b1p, w2tp, b2.astype(jnp.float32).reshape(1, 1), fcwp, fcbp)
    return out[:N, :n_out]


# ----------------------------------------------------------------------------
# Host-side glue: dynamic hyperedge selection (index prep, not the hot path)
# ----------------------------------------------------------------------------
def kmeans_np(x, n_cluster, iters=10):
    centers = x[:n_cluster].copy()
    for _ in range(iters):
        d2 = ((x[:, None, :] - centers[None, :, :]) ** 2).sum(-1)
        labels = d2.argmin(1)
        for c in range(n_cluster):
            members = x[labels == c]
            if members.shape[0] > 0:
                centers[c] = members.mean(0)
    d2 = ((x[:, None, :] - centers[None, :, :]) ** 2).sum(-1)
    return centers, d2.argmin(1)


def cluster_select_idx(x_np, ids_np, n_cluster, n_center, kc):
    # TODO(synk): original uses sklearn KMeans + np.random.choice sampling of
    # cluster members; replaced by deterministic Lloyd + wrap-around sampling.
    centers, labels = kmeans_np(x_np, n_cluster)
    d2 = ((x_np[:, None, :] - centers[None, :, :]) ** 2).sum(-1)
    nearest_centers = np.argsort(d2, axis=1)[:, :n_center]
    members = [np.where(labels == c)[0] for c in range(n_cluster)]
    idx = np.zeros((len(ids_np), n_center, kc), dtype=np.int32)
    for p_i, p in enumerate(ids_np):
        for c_i in range(n_center):
            c = int(nearest_centers[p, c_i])
            mem = members[c] if len(members[c]) > 0 else np.array([p])
            idx[p_i, c_i, :] = mem[np.arange(kc) % len(mem)]
    return idx


def structure_select_idx(edge_dict, ids_np, ks):
    # TODO(synk): original uses random sample_ids(); deterministic wrap-around here.
    idx = np.zeros((len(edge_dict), ks), dtype=np.int32)
    for i, nbrs in enumerate(edge_dict):
        nbrs = np.asarray(nbrs, dtype=np.int32)
        idx[i] = nbrs[np.arange(ks) % len(nbrs)]
    return idx[ids_np]


def nearest_select(x, ids, kn):
    norm = jnp.sqrt(jnp.sum(x * x, axis=1, keepdims=True))
    x_n = x / jnp.maximum(norm, 1e-12)
    sim = pallas_cosine_sim(x_n)                          # (N, N), no x.T in HBM
    _, idx = jax.lax.top_k(sim, kn)
    idx = idx[ids]
    return x[idx.reshape(-1)].reshape(ids.shape[0], kn, x.shape[1])


# ----------------------------------------------------------------------------
# Model forward
# ----------------------------------------------------------------------------
def hgnn_conv_forward(x, G, p):
    # relu(fc(x)) then G @ x, fused + contraction-tiled; dropout: eval -> id
    return pallas_hgnn_conv(G, x, p["fc_w"], p["fc_b"])


def dhg_layer_forward(ids, x, edge_dict, ite, p, cfg):
    N, d = x.shape                                        # d is the padded width
    # TODO(synk): k-means needs host numpy on the intermediate features -> one
    # unavoidable device->host sync per forward (as in the original sklearn code).
    x_np = np.asarray(jax.device_get(x))
    ids_np = np.asarray(jax.device_get(ids))
    nids = len(ids_np)
    hyperedges = []                                       # stacked on axis 0: (t, nids, d)
    if ite >= cfg["wu_kmeans"]:
        n_center, kc = cfg["adjacent_centers"], cfg["k_cluster"]
        c_idx = cluster_select_idx(x_np, ids_np, cfg["clusters"], n_center, kc)
        c_idx_t = np.transpose(c_idx, (1, 0, 2)).reshape(-1)     # center-major
        c_feat = x[jnp.asarray(c_idx_t)].reshape(n_center * nids, kc, d)
        xc = pallas_vertex_conv(c_feat, p["vc_c"])        # all centers, one launch
        hyperedges.append(xc.reshape(n_center, nids, d))
    if ite >= cfg["wu_knn"]:
        n_feat = nearest_select(x, ids, cfg["k_nearest"])
        xn = pallas_vertex_conv(n_feat, p["vc_n"])
        hyperedges.append(xn[None])
    if ite >= cfg["wu_struct"]:
        s_idx = structure_select_idx(edge_dict, ids_np, cfg["k_structured"])
        s_feat = x[jnp.asarray(s_idx).reshape(-1)].reshape(
            nids, cfg["k_structured"], d)
        xs = pallas_vertex_conv(s_feat, p["vc_s"])
        hyperedges.append(xs[None])

    ft = jnp.concatenate(hyperedges, axis=0)              # (t, nids, d)
    # EdgeConv + fc + sigmoid fused (dropout layers: eval -> identity)
    return pallas_edge_conv_fc(ft, p["ec"], p["fc_w"], p["fc_b"],
                               cfg["n_categories"])


def dhgnn_forward(ids, feats, edge_dict, G, ite, params, cfg):
    x = hgnn_conv_forward(feats, G, params["layer0"])
    x = dhg_layer_forward(ids, x, edge_dict, ite, params["layer1"], cfg)
    # final torch.sigmoid (the DHGLayer activation is also Sigmoid, per the
    # PyTorch module's activation list -> double sigmoid is the reference behaviour)
    return jax.nn.sigmoid(x)


# ----------------------------------------------------------------------------
# Deterministic parameter init
# ----------------------------------------------------------------------------
def init_params(key, cfg):
    d_in, d_h, d_out = cfg["dim_feat"], cfg["layer_spec"][0], cfg["n_categories"]
    ks, kn, kc = cfg["k_structured"], cfg["k_nearest"], cfg["k_cluster"]
    h_ec = d_h // 4

    def nrm(k, shape, scale=0.1):
        return scale * jax.random.normal(k, shape, jnp.float32)

    keys = jax.random.split(key, 20)

    def vc(k1, k2, k3, k4, kk):
        # (grouped-conv weight viewed as (k,k,d), its bias (k,k),
        #  Conv1d(k,1,1) weight (1,k), its bias (1,1))
        return (nrm(k1, (kk, kk, d_h)), nrm(k2, (kk, kk)),
                nrm(k3, (1, kk)), nrm(k4, (1, 1)))

    return {
        "layer0": {"fc_w": nrm(keys[0], (d_in, d_h)), "fc_b": nrm(keys[1], (d_h,))},
        "layer1": {
            "fc_w": nrm(keys[2], (d_h, d_out)), "fc_b": nrm(keys[3], (d_out,)),
            "vc_s": vc(keys[4], keys[5], keys[6], keys[7], ks),
            "vc_n": vc(keys[8], keys[9], keys[10], keys[11], kn),
            "vc_c": vc(keys[12], keys[13], keys[14], keys[15], kc),
            # EdgeConv MLP: Linear(d_h, h_ec) -> ReLU -> Linear(h_ec, 1)
            "ec": (nrm(keys[16], (d_h, h_ec)), nrm(keys[17], (h_ec,)),
                   nrm(keys[18], (1, h_ec)), nrm(keys[19], (1, 1))),
        },
    }


if __name__ == "__main__":
    cfg = dict(dim_feat=32, n_categories=8, n_layers=2, layer_spec=[32],
               dropout_rate=0.5, has_bias=True,
               k_structured=8, k_nearest=8, k_cluster=4,
               wu_knn=0, wu_kmeans=0, wu_struct=0,
               clusters=4, adjacent_centers=1)
    N = 64
    ite = 1

    key = jax.random.PRNGKey(0)
    k_feat, k_G, k_param = jax.random.split(key, 3)
    feats = jax.random.normal(k_feat, (N, cfg["dim_feat"]), jnp.float32)
    A = jnp.abs(jax.random.normal(k_G, (N, N), jnp.float32))
    A = A + A.T + jnp.eye(N, dtype=jnp.float32)
    G = A / jnp.sum(A, axis=1, keepdims=True)                # synthetic hypergraph op
    ids = jnp.arange(N, dtype=jnp.int32)
    # synthetic adjacency (edge_dict): ring neighbourhood incl. self
    edge_dict = [[(i + off) % N for off in (-2, -1, 0, 1, 2)] for i in range(N)]

    params = init_params(k_param, cfg)
    out = dhgnn_forward(ids, feats, edge_dict, G, ite, params, cfg)
    out = jax.block_until_ready(out)
    assert out.shape == (N, cfg["n_categories"])
    assert bool(jnp.all(jnp.isfinite(out)))
    print("KERNEL_OK")
</pallas_src>

<mosaic_0001>
module attributes {stable_mosaic.version = 11 : i64} {
  func.func @_hgnn_conv_kernel(%arg0: i32, %arg1: i32, %arg2: memref<64x64xbf16, #tpu.memory_space<vmem>>, %arg3: memref<64x32xbf16, #tpu.memory_space<vmem>>, %arg4: memref<32x128xbf16, #tpu.memory_space<vmem>>, %arg5: memref<1x128xf32, #tpu.memory_space<vmem>>, %arg6: memref<64x128xf32, #tpu.memory_space<vmem>>, %arg7: memref<64x128xf32, #tpu.memory_space<vmem>>) attributes {dimension_semantics = [#tpu.dimension_semantics<parallel>, #tpu.dimension_semantics<arbitrary>], iteration_bounds = array<i64: 1, 1>, scalar_prefetch = 0 : i64, scratch_operands = 1 : i64, tpu.core_type = #tpu.core_type<tc>, window_params = [{transform_indices = @transform_0, window_bounds = array<i64: 64, 64>}, {transform_indices = @transform_1, window_bounds = array<i64: 64, 32>}, {pipeline_mode = #tpu.pipeline_mode<synchronous>, transform_indices = @transform_2, window_bounds = array<i64: 32, 128>}, {pipeline_mode = #tpu.pipeline_mode<synchronous>, transform_indices = @transform_3, window_bounds = array<i64: 1, 128>}, {transform_indices = @transform_4, window_bounds = array<i64: 64, 128>}]} {
    %c0_i32 = arith.constant 0 : i32
    %0 = arith.cmpi eq, %arg1, %c0_i32 : i32
    %1 = arith.extui %0 : i1 to i32
    %c0_i32_0 = arith.constant 0 : i32
    %2 = arith.cmpi ne, %1, %c0_i32_0 : i32
    scf.if %2 {
      %cst_16 = arith.constant 0.000000e+00 : f32
      %20 = vector.broadcast %cst_16 : f32 to vector<64x128xf32>
      %c0_17 = arith.constant 0 : index
      %c0_18 = arith.constant 0 : index
      %21 = vector.load %arg7[%c0_17, %c0_18] : memref<64x128xf32, #tpu.memory_space<vmem>>, vector<64x128xf32>
      tpu.vector_store %arg7[%c0_17, %c0_18], %20 {strides = array<i32>} : memref<64x128xf32, #tpu.memory_space<vmem>>, vector<64x128xf32>,
    } else {
    }
    %c0 = arith.constant 0 : index
    %c0_1 = arith.constant 0 : index
    %3 = vector.load %arg3[%c0, %c0_1] : memref<64x32xbf16, #tpu.memory_space<vmem>>, vector<64x32xbf16>
    %c0_2 = arith.constant 0 : index
    %c0_3 = arith.constant 0 : index
    %4 = vector.load %arg4[%c0_2, %c0_3] : memref<32x128xbf16, #tpu.memory_space<vmem>>, vector<32x128xbf16>
    %cst = arith.constant dense<0.000000e+00> : vector<64x128xf32>
    %5 = tpu.matmul %3, %4, %cst {dimension_numbers = #tpu.dot_dimension_numbers<[1], [0], [0], [1], [0, 0, 1, 1], [], []>} : vector<64x32xbf16>, vector<32x128xbf16>, vector<64x128xf32> -> vector<64x128xf32>
    %c0_4 = arith.constant 0 : index
    %c0_5 = arith.constant 0 : index
    %6 = vector.load %arg5[%c0_4, %c0_5] : memref<1x128xf32, #tpu.memory_space<vmem>>, vector<1x128xf32>
    %7 = vector.broadcast %6 : vector<1x128xf32> to vector<64x128xf32>
    %8 = arith.addf %5, %7 : vector<64x128xf32>
    %cst_6 = arith.constant 0.000000e+00 : f32
    %9 = vector.broadcast %cst_6 : f32 to vector<64x128xf32>
    %10 = arith.maximumf %8, %9 : vector<64x128xf32>
    %c0_7 = arith.constant 0 : index
    %c0_8 = arith.constant 0 : index
    %11 = vector.load %arg7[%c0_7, %c0_8] : memref<64x128xf32, #tpu.memory_space<vmem>>, vector<64x128xf32>
    %c0_9 = arith.constant 0 : index
    %c0_10 = arith.constant 0 : index
    %12 = vector.load %arg2[%c0_9, %c0_10] : memref<64x64xbf16, #tpu.memory_space<vmem>>, vector<64x64xbf16>
    %13 = arith.truncf %10 : vector<64x128xf32> to vector<64x128xbf16>
    %cst_11 = arith.constant dense<0.000000e+00> : vector<64x128xf32>
    %14 = tpu.matmul %12, %13, %cst_11 {dimension_numbers = #tpu.dot_dimension_numbers<[1], [0], [0], [1], [0, 0, 1, 1], [], []>} : vector<64x64xbf16>, vector<64x128xbf16>, vector<64x128xf32> -> vector<64x128xf32>
    %15 = arith.addf %11, %14 : vector<64x128xf32>
    %c0_12 = arith.constant 0 : index
    %c0_13 = arith.constant 0 : index
    %16 = vector.load %arg7[%c0_12, %c0_13] : memref<64x128xf32, #tpu.memory_space<vmem>>, vector<64x128xf32>
    tpu.vector_store %arg7[%c0_12, %c0_13], %15 {strides = array<i32>} : memref<64x128xf32, #tpu.memory_space<vmem>>, vector<64x128xf32>,
    %c0_i32_14 = arith.constant 0 : i32
    %17 = arith.cmpi eq, %arg1, %c0_i32_14 : i32
    %18 = arith.extui %17 : i1 to i32
    %c0_i32_15 = arith.constant 0 : i32
    %19 = arith.cmpi ne, %18, %c0_i32_15 : i32
    scf.if %19 {
      %c0_16 = arith.constant 0 : index
      %c0_17 = arith.constant 0 : index
      %20 = vector.load %arg7[%c0_16, %c0_17] : memref<64x128xf32, #tpu.memory_space<vmem>>, vector<64x128xf32>
      %c0_18 = arith.constant 0 : index
      %c0_19 = arith.constant 0 : index
      %21 = vector.load %arg6[%c0_18, %c0_19] : memref<64x128xf32, #tpu.memory_space<vmem>>, vector<64x128xf32>
      tpu.vector_store %arg6[%c0_18, %c0_19], %20 {strides = array<i32>} : memref<64x128xf32, #tpu.memory_space<vmem>>, vector<64x128xf32>,
    } else {
    }
    return
  }
  func.func @transform_0(%arg0: i32, %arg1: i32) -> (i32, i32) {
    %c0_i32 = arith.constant 0 : i32
    return %arg0, %arg1 : i32, i32
  }
  func.func @transform_1(%arg0: i32, %arg1: i32) -> (i32, i32) {
    %c0_i32 = arith.constant 0 : i32
    %c0_i32_0 = arith.constant 0 : i32
    return %arg1, %c0_i32 : i32, i32
  }
  func.func @transform_2(%arg0: i32, %arg1: i32) -> (i32, i32) {
    %c0_i32 = arith.constant 0 : i32
    %c0_i32_0 = arith.constant 0 : i32
    %c0_i32_1 = arith.constant 0 : i32
    return %c0_i32, %c0_i32_0 : i32, i32
  }
  func.func @transform_3(%arg0: i32, %arg1: i32) -> (i32, i32) {
    %c0_i32 = arith.constant 0 : i32
    %c0_i32_0 = arith.constant 0 : i32
    %c0_i32_1 = arith.constant 0 : i32
    return %c0_i32, %c0_i32_0 : i32, i32
  }
  func.func @transform_4(%arg0: i32, %arg1: i32) -> (i32, i32) {
    %c0_i32 = arith.constant 0 : i32
    %c0_i32_0 = arith.constant 0 : i32
    return %arg0, %c0_i32 : i32, i32
  }
}

</mosaic_0001>

<bundles_post_ra>
// kernel: tpu_custom_call.1
= control target key start
LH: loop header
LB: loop body
LE: loop exit
PB: predicated region body
PF: predicated region fallthrough
CT: control target
= control target key end

     0   :  { %s422_s0 = inlined_call_operand.vmem [shape: bf16[64,64], index: 0, kind: input, shape index: {}]   ;;  %s423_s1 = inlined_call_operand.vmem [shape: bf16[64,32], index: 1, kind: input, shape index: {}]   ;;  %s424_s2 = inlined_call_operand.vmem [shape: bf16[32,128], index: 2, kind: input, shape index: {}]   ;;  %s425_s3 = inlined_call_operand.vmem [shape: f32[1,128], index: 3, kind: input, shape index: {}]   ;;  %s426_s4 = inlined_call_operand.hbm [shape: f32[64,128], index: 4, kind: output, shape index: {}]  }
   0x1   :  { %v317_v0 = vld [vmem:[%s424_s2 + $0x8] sm:$0xff]  ;;  %v316_v1 = vld [vmem:[%s424_s2] sm:$0xff] }
   0x2   :  { %322 = vmatpush.bf16.msra.mxu3 %v317_v0  ;;  %98 = vmatpush.bf16.msra.mxu0 %v317_v0 }
   0x3   :  { %9 = vsyncpa [#allocation4], 0  ;;  %v313_v2 = vld [vmem:[%s423_s1 + $0x8] sm:$0xff]  ;;  %vm79_vm0 = vcmask 261120   ;;  %v312_v3 = vld [vmem:[%s423_s1] sm:$0xff]  ;;  %vm169_vm1 = vcmask 523264  }
   0x4   :  { %v314_v4 = vld [vmem:[%s423_s1 + $0x10] sm:$0xff]  ;;  %v315_v5 = vld [vmem:[%s423_s1 + $0x18] sm:$0xff]  ;;  %v331_v12 = vld [vmem:[%s425_s3] ss:$0 sm:$0xff]  ;;  %s358_s8 = smov [#allocation3]   ;;  %s252_s11 = sshll.u32 %s426_s4, 4  ;;  %s253_s11 = int_to_ptr.hbm [resolvable:$true] %s252_s11 }
   0x5   :  { %v318_v35 = vld [vmem:[%s422_s0] sm:$0xff]  ;;  %v320_v36 = vld [vmem:[%s422_s0 + $0x10] sm:$0xff]  ;;  %v319_v37 = vld [vmem:[%s422_s0 + $0x8] sm:$0xff]  ;;  %s250_s9 = sshll.u32 %s358_s8, 4  ;;  %s359_s12 = smov 128   ;;  %s251_s9 = int_to_ptr.vmem [resolvable:$true] %s250_s9 }
   0x6   :  { %323 = vmatpush.bf16.msra.mxu3 %v316_v1  ;;  %99 = vmatpush.bf16.msra.mxu0 %v316_v1  ;;  %v321_v38 = vld [vmem:[%s422_s0 + $0x18] sm:$0xff]  ;;  %s360_s13 = smov 8  }
   0x9   :  { %289 = vmatmul.msk.bf16.vlgmr.msra.gmra.mxu3 %vm79_vm0, %v313_v2  ;;  %288 = vmatmul.msk.bf16.vlgmr.msra.gmra.mxu0 %vm79_vm0, %v312_v3 }
  0x19   :  { %290 = vmatmul.msk.bf16.gmra.mxu3 %vm79_vm0, %v314_v4 }
  0x29   :  { %291 = vmatmul.msk.bf16.gmra.mxu3 %vm79_vm0, %v315_v5 }
  0x86   :  { %v101_v11 = vpop.f32.mrf.mxu0 }
  0x87   :  { %v102_v27 = vadd.f32 %v331_v12, %v101_v11 }
  0x89   :  { %v121_v31 = vmax.f32 %v102_v27, 0.0 }
  0x8c   :  { %v106_v6 = vpop.f32.mrf.mxu3 }
  0x8d   :  { %v107_v24 = vadd.f32 %v331_v12, %v106_v6 }
  0x8e   :  { %v103_v23 = vpop.f32.mrf.mxu0 }
  0x8f   :  { %v104_v28 = vadd.f32 %v331_v12, %v103_v23  ;;  %v123_v30 = vmax.f32 %v107_v24, 0.0 }
  0x91   :  { %v122_v32 = vmax.f32 %v104_v28, 0.0 }
  0x93   :  { %v145_v34 = vpack.c.bf16 %v122_v32, %v121_v31 }
  0x94   :  { %v108_v7 = vpop.f32.mrf.mxu3 }
  0x95   :  { %v109_v20 = vadd.f32 %v331_v12, %v108_v7 }
  0x97   :  { %v124_v26 = vmax.f32 %v109_v20, 0.0 }
  0x99   :  { %v146_v33 = vpack.c.bf16 %v124_v26, %v123_v30 }
  0x9c   :  { %v111_v8 = vpop.f32.mrf.mxu3 }
  0x9d   :  { %v112_v17 = vadd.f32 %v331_v12, %v111_v8 }
  0x9f   :  { %v125_v25 = vmax.f32 %v112_v17, 0.0 }
  0xa4   :  { %v113_v9 = vpop.f32.mrf.mxu3 }
  0xa5   :  { %v114_v15 = vadd.f32 %v331_v12, %v113_v9 }
  0xa7   :  { %v126_v21 = vmax.f32 %v114_v15, 0.0 }
  0xa9   :  { %v147_v29 = vpack.c.bf16 %v126_v21, %v125_v25 }
  0xac   :  { %v116_v10 = vpop.f32.mrf.mxu3 }
  0xad   :  { %v117_v13 = vadd.f32 %v331_v12, %v116_v10 }
  0xaf   :  { %v127_v18 = vmax.f32 %v117_v13, 0.0 }
  0xb4   :  { %v118_v14 = vpop.f32.mrf.mxu3 }
  0xb5   :  { %v119_v16 = vadd.f32 %v331_v12, %v118_v14 }
  0xb7   :  { %v128_v19 = vmax.f32 %v119_v16, 0.0 }
  0xb9   :  { %v148_v22 = vpack.c.bf16 %v128_v19, %v127_v18 }
  0xbb   :  { %186 = vmatpush.bf16.msra.mxu1 %v148_v22  ;;  %324 = vmatpush.bf16.msra.mxu2 %v148_v22 }
  0xbf   :  { %187 = vmatpush.bf16.msra.mxu1 %v147_v29  ;;  %325 = vmatpush.bf16.msra.mxu2 %v147_v29 }
  0xc3   :  { %188 = vmatpush.bf16.msra.mxu1 %v146_v33  ;;  %326 = vmatpush.bf16.msra.mxu2 %v146_v33 }
  0xc7   :  { %189 = vmatpush.bf16.msra.mxu1 %v145_v34  ;;  %327 = vmatpush.bf16.msra.mxu2 %v145_v34 }
  0xca   :  { %308 = vmatmul.msk.bf16.vlgmr.msra.gmra.mxu1 %vm169_vm1, %v318_v35  ;;  %310 = vmatmul.msk.bf16.vlgmr.msra.gmra.mxu2 %vm169_vm1, %v320_v36 }
  0xda   :  { %309 = vmatmul.msk.bf16.gmra.mxu1 %vm169_vm1, %v319_v37  ;;  %311 = vmatmul.msk.bf16.gmra.mxu2 %vm169_vm1, %v321_v38 }
 0x147   :  { %v191_v39 = vpop.f32.mrf.mxu1 }
 0x148   :  { %238 = vst [vmem:[#allocation3] sm:$0xff] %v191_v39 }
 0x14d   :  { %v201_v40 = vpop.f32.mrf.mxu2 }
 0x14e   :  { %242 = vst [vmem:[#allocation3 + $0x20] sm:$0xff] %v201_v40 }
 0x14f   :  { %v193_v41 = vpop.f32.mrf.mxu1 }
 0x150   :  { %239 = vst [vmem:[#allocation3 + $0x8] sm:$0xff] %v193_v41 }
 0x155   :  { %v203_v42 = vpop.f32.mrf.mxu2 }
 0x156   :  { %243 = vst [vmem:[#allocation3 + $0x28] sm:$0xff] %v203_v42 }
 0x157   :  { %v196_v43 = vpop.f32.mrf.mxu1 }
 0x158   :  { %240 = vst [vmem:[#allocation3 + $0x10] sm:$0xff] %v196_v43 }
 0x15d   :  { %v206_v44 = vpop.f32.mrf.mxu2 }
 0x15e   :  { %244 = vst [vmem:[#allocation3 + $0x30] sm:$0xff] %v206_v44 }
 0x15f   :  { %v198_v45 = vpop.f32.mrf.mxu1 }
 0x160   :  { %241 = vst [vmem:[#allocation3 + $0x18] sm:$0xff] %v198_v45 }
 0x165   :  { %v208_v46 = vpop.f32.mrf.mxu2 }
 0x166   :  { %245 = vst [vmem:[#allocation3 + $0x38] sm:$0xff] %v208_v46 }
 0x167   :  { %258 = dma.vmem_to_hbm [thread:$0]  %s251_s9, 1024, %s253_s11, [#allocation4], %s359_s12, %s359_s12, %s360_s13  }
 0x168   :  { %356 = dma.done.wait [#allocation4], 1024  }
 0x169   :  { %357 = vsyncadd [#allocation4], 4294966272 }
 0x16a   :  { %263 = vsyncpa [#allocation4], 1 }

</bundles_post_ra>
